<compile_context>
chip_gen: v7x
topology: tpu7x:2x2x1
jax: 0.10.0
libtpu: 0.0.40
codegen_flags: <defaults>
</compile_context>

<pallas_src>
import math

import jax
import jax.numpy as jnp
from jax.experimental import pallas as pl
from jax.experimental.pallas import tpu as pltpu

_HALF_LOG_2PI = 0.5 * math.log(2.0 * math.pi)
_LANES = 128
_TILE_BYTES = 8 << 20      # streamed bytes per grid step (double-buffered -> ~16 MiB VMEM)
_VMEM_LIMIT = 40 << 20     # explicit scoped-VMEM budget; fits v7x's 64 MiB physical VMEM


def _row_tile(total_rows, bytes_per_row, block_rows=None):
    """Rows per block: full array (always a legal BlockSpec) or a multiple of 8 rows
    sized so each grid step streams ~_TILE_BYTES (dtype-aware via bytes_per_row)."""
    if block_rows is None:
        rows = max(1, _TILE_BYTES // max(1, int(bytes_per_row)))
    else:
        rows = max(1, int(block_rows))
    rows = max(8, (rows // 8) * 8)
    if rows >= total_rows:
        return total_rows
    return rows


class GaussianPriorDistribution:
    """Mimics td.Independent(td.Normal(mean, std), 1) with Pallas-backed ops."""

    def __init__(self, mean, std):
        mean = jnp.asarray(mean, jnp.float32).reshape(-1)
        std = jnp.asarray(std, jnp.float32).reshape(-1)
        self.M = int(mean.shape[0])
        M = self.M
        inv_std = 1.0 / std

        # Hoisted normalizer: sum(log std) + M * 0.5*log(2*pi) (compile-time constant).
        self._log_norm = float(jnp.sum(jnp.log(std)) + M * _HALF_LOG_2PI)
        self._standard = bool(jnp.all(mean == 0.0)) and bool(jnp.all(std == 1.0))

        # Lane packing: G latent vectors per 128-lane row when M divides 128.
        self._groups = _LANES // M if (M <= _LANES and _LANES % M == 0) else 1

        # Pre-tiled params + MXU reduction weights for both layouts (packed / unpacked).
        self._params = {1: self._build_rows(mean, std, inv_std, 1)}
        if self._groups > 1:
            self._params[self._groups] = self._build_rows(mean, std, inv_std, self._groups)

        log_norm = self._log_norm

        # ---- kernels built ONCE (stable identity; no per-call retrace) ----
        def logprob_kernel(z_ref, mean_ref, w_ref, out_ref):
            z = z_ref[...].astype(jnp.float32)          # in-kernel cast (bf16-safe)
            t = z - mean_ref[...]                       # (rows, L); params broadcast
            # MXU reduction; W holds -0.5 * inv_std^2 per lane, grouped per packed vector.
            out_ref[...] = jnp.dot(t * t, w_ref[...],
                                   preferred_element_type=jnp.float32) - log_norm

        self._logprob_kernel = logprob_kernel

        if self._standard:
            def sample_kernel(eps_ref, out_ref):
                out_ref[...] = eps_ref[...].astype(out_ref.dtype)
        else:
            def sample_kernel(eps_ref, mean_ref, std_ref, out_ref):
                out_ref[...] = (mean_ref[...]
                                + std_ref[...] * eps_ref[...]).astype(out_ref.dtype)
        self._sample_kernel = sample_kernel

    def _build_rows(self, mean, std, inv_std, groups):
        M = self.M
        L = groups * M
        mean_row = jnp.tile(mean, groups).reshape(1, L)
        std_row = jnp.tile(std, groups).reshape(1, L)
        neg_half_inv_var = -0.5 * jnp.tile(inv_std * inv_std, groups)        # (L,)
        lane_group = (jnp.arange(L) // M)[:, None]                           # (L, 1)
        w = jnp.where(lane_group == jnp.arange(groups)[None, :],
                      neg_half_inv_var[:, None], 0.0).astype(jnp.float32)    # (L, G)
        return mean_row, std_row, w

    def _layout(self, batch):
        g = self._groups if (self._groups > 1 and batch % self._groups == 0) else 1
        return g, g * self.M, batch // g

    # ---------------- log_prob ----------------
    def log_prob(self, z, block_rows=None):
        B, M = z.shape
        assert M == self.M
        g, L, R = self._layout(B)
        mean_row, _, w = self._params[g]
        zp = z.reshape(R, L)                                   # free row-major reshape
        bytes_per_row = L * zp.dtype.itemsize + g * 4
        tb = _row_tile(R, bytes_per_row, block_rows)

        out = pl.pallas_call(
            self._logprob_kernel,
            out_shape=jax.ShapeDtypeStruct((R, g), jnp.float32),
            grid_spec=pl.GridSpec(
                grid=(pl.cdiv(R, tb),),
                in_specs=[
                    pl.BlockSpec((tb, L), lambda i: (i, 0)),   # z: batch-tiled, lane-dense
                    pl.BlockSpec((1, L), lambda i: (0, 0)),    # mean: resident
                    pl.BlockSpec((L, g), lambda i: (0, 0)),    # MXU weights: resident
                ],
                out_specs=pl.BlockSpec((tb, g), lambda i: (i, 0)),
            ),
            compiler_params=pltpu.CompilerParams(
                dimension_semantics=("parallel",),
                vmem_limit_bytes=_VMEM_LIMIT),
        )(zp, mean_row, w)
        return out.reshape(B)

    # ---------------- sample ----------------
    def sample(self, key, batch, dtype=jnp.float32, block_rows=None):
        M = self.M
        g, L, R = self._layout(batch)
        out_dtype = jnp.dtype(dtype)
        eps = jax.random.normal(key, (batch, M), dtype=jnp.float32).reshape(R, L)
        mean_row, std_row, _ = self._params[g]

        bytes_per_row = L * 4 + L * out_dtype.itemsize
        tb = _row_tile(R, bytes_per_row, block_rows)

        if self._standard:
            operands = (eps,)
            in_specs = [pl.BlockSpec((tb, L), lambda i: (i, 0))]
        else:
            operands = (eps, mean_row, std_row)
            in_specs = [
                pl.BlockSpec((tb, L), lambda i: (i, 0)),       # eps: batch-tiled
                pl.BlockSpec((1, L), lambda i: (0, 0)),        # mean: resident
                pl.BlockSpec((1, L), lambda i: (0, 0)),        # std: resident
            ]

        out = pl.pallas_call(
            self._sample_kernel,
            out_shape=jax.ShapeDtypeStruct((R, L), out_dtype),
            grid_spec=pl.GridSpec(
                grid=(pl.cdiv(R, tb),),
                in_specs=in_specs,
                out_specs=pl.BlockSpec((tb, L), lambda i: (i, 0)),  # lane-dense stores
            ),
            compiler_params=pltpu.CompilerParams(
                dimension_semantics=("parallel",),
                vmem_limit_bytes=_VMEM_LIMIT),
        )(*operands)
        return out.reshape(batch, M)

    rsample = sample


class GaussianPrior:
    """JAX/Pallas port of the PyTorch GaussianPrior module."""

    def __init__(self, M):
        self.M = M
        # nn.Parameter(torch.zeros(M)) / nn.Parameter(torch.ones(M)), non-trainable.
        self.mean = jnp.zeros((M,), dtype=jnp.float32)
        self.std = jnp.ones((M,), dtype=jnp.float32)
        # Build the distribution (and its kernels) once -> stable kernel identity.
        self._dist = GaussianPriorDistribution(self.mean, self.std)

    def forward(self):
        # Returns the prior distribution object (Independent(Normal(mean, std), 1)).
        return self._dist

    __call__ = forward


if __name__ == "__main__":
    M = 32      # latent dimension
    B = 64      # batch of latent samples to evaluate

    prior = GaussianPrior(M)
    dist = prior()

    key = jax.random.PRNGKey(0)
    kz, ks = jax.random.split(key)
    z = jax.random.normal(kz, (B, M), dtype=jnp.float32)

    logp = dist.log_prob(z)                        # auto tile (single block here)
    logp_tiled = dist.log_prob(z, block_rows=8)    # exercises the multi-block grid
    samp = dist.sample(ks, B)
    samp_bf16 = dist.sample(ks, B, dtype=jnp.bfloat16)
    jax.block_until_ready((logp, logp_tiled, samp, samp_bf16))

    # Reference: Independent(Normal(0, 1), 1).log_prob semantics in plain JAX.
    ref = jnp.sum(-0.5 * z * z - _HALF_LOG_2PI, axis=-1)
    assert logp.shape == (B,)
    assert jnp.allclose(logp, ref, atol=1e-4, rtol=1e-4)
    assert jnp.allclose(logp_tiled, ref, atol=1e-4, rtol=1e-4)
    assert samp.shape == (B, M) and samp_bf16.shape == (B, M)
    assert bool(jnp.all(jnp.isfinite(samp)))
    assert abs(float(jnp.mean(samp))) < 0.25
    assert 0.7 < float(jnp.std(samp)) < 1.3

    # Fallback (non-lane-packed) path: M not a divisor of 128, nontrivial mean/std.
    M2, B2 = 100, 16
    k1, k2, k3 = jax.random.split(jax.random.PRNGKey(1), 3)
    mean2 = jax.random.normal(k1, (M2,), dtype=jnp.float32)
    std2 = 0.5 + jax.random.uniform(k2, (M2,), dtype=jnp.float32)
    dist2 = GaussianPriorDistribution(mean2, std2)
    z2 = jax.random.normal(k3, (B2, M2), dtype=jnp.float32)
    lp2 = dist2.log_prob(z2)
    s2 = dist2.sample(jax.random.PRNGKey(2), B2)
    jax.block_until_ready((lp2, s2))
    ref2 = jnp.sum(-0.5 * ((z2 - mean2) / std2) ** 2
                   - jnp.log(std2) - _HALF_LOG_2PI, axis=-1)
    assert jnp.allclose(lp2, ref2, atol=1e-3, rtol=1e-3)
    assert s2.shape == (B2, M2)
    assert bool(jnp.all(jnp.isfinite(s2)))

    print("KERNEL_OK")
</pallas_src>

<mosaic_0001>
module attributes {stable_mosaic.version = 11 : i64} {
  func.func @logprob_kernel(%arg0: i32, %arg1: memref<16x128xf32, #tpu.memory_space<vmem>>, %arg2: memref<1x128xf32, #tpu.memory_space<vmem>>, %arg3: memref<128x4xf32, #tpu.memory_space<vmem>>, %arg4: memref<16x4xf32, #tpu.memory_space<vmem>>) attributes {dimension_semantics = [#tpu.dimension_semantics<parallel>], iteration_bounds = array<i64: 1>, scalar_prefetch = 0 : i64, scratch_operands = 0 : i64, tpu.core_type = #tpu.core_type<tc>, window_params = [{transform_indices = @transform_0, window_bounds = array<i64: 16, 128>}, {pipeline_mode = #tpu.pipeline_mode<synchronous>, transform_indices = @transform_1, window_bounds = array<i64: 1, 128>}, {pipeline_mode = #tpu.pipeline_mode<synchronous>, transform_indices = @transform_2, window_bounds = array<i64: 128, 4>}, {transform_indices = @transform_3, window_bounds = array<i64: 16, 4>}]} {
    %c0 = arith.constant 0 : index
    %c0_0 = arith.constant 0 : index
    %0 = vector.load %arg1[%c0, %c0_0] : memref<16x128xf32, #tpu.memory_space<vmem>>, vector<16x128xf32>
    %c0_1 = arith.constant 0 : index
    %c0_2 = arith.constant 0 : index
    %1 = vector.load %arg2[%c0_1, %c0_2] : memref<1x128xf32, #tpu.memory_space<vmem>>, vector<1x128xf32>
    %2 = vector.broadcast %1 : vector<1x128xf32> to vector<16x128xf32>
    %3 = arith.subf %0, %2 : vector<16x128xf32>
    %4 = arith.mulf %3, %3 : vector<16x128xf32>
    %c0_3 = arith.constant 0 : index
    %c0_4 = arith.constant 0 : index
    %5 = vector.load %arg3[%c0_3, %c0_4] : memref<128x4xf32, #tpu.memory_space<vmem>>, vector<128x4xf32>
    %cst = arith.constant dense<0.000000e+00> : vector<16x4xf32>
    %6 = tpu.matmul %4, %5, %cst {dimension_numbers = #tpu.dot_dimension_numbers<[1], [0], [0], [1], [0, 0, 1, 1], [], []>} : vector<16x128xf32>, vector<128x4xf32>, vector<16x4xf32> -> vector<16x4xf32>
    %cst_5 = arith.constant 29.4060326 : f32
    %7 = vector.broadcast %cst_5 : f32 to vector<16x4xf32>
    %8 = arith.subf %6, %7 : vector<16x4xf32>
    %c0_6 = arith.constant 0 : index
    %c0_7 = arith.constant 0 : index
    %9 = vector.load %arg4[%c0_6, %c0_7] : memref<16x4xf32, #tpu.memory_space<vmem>>, vector<16x4xf32>
    tpu.vector_store %arg4[%c0_6, %c0_7], %8 {strides = array<i32>} : memref<16x4xf32, #tpu.memory_space<vmem>>, vector<16x4xf32>,
    return
  }
  func.func @transform_0(%arg0: i32) -> (i32, i32) {
    %c0_i32 = arith.constant 0 : i32
    %c0_i32_0 = arith.constant 0 : i32
    return %arg0, %c0_i32 : i32, i32
  }
  func.func @transform_1(%arg0: i32) -> (i32, i32) {
    %c0_i32 = arith.constant 0 : i32
    %c0_i32_0 = arith.constant 0 : i32
    %c0_i32_1 = arith.constant 0 : i32
    return %c0_i32, %c0_i32_0 : i32, i32
  }
  func.func @transform_2(%arg0: i32) -> (i32, i32) {
    %c0_i32 = arith.constant 0 : i32
    %c0_i32_0 = arith.constant 0 : i32
    %c0_i32_1 = arith.constant 0 : i32
    return %c0_i32, %c0_i32_0 : i32, i32
  }
  func.func @transform_3(%arg0: i32) -> (i32, i32) {
    %c0_i32 = arith.constant 0 : i32
    %c0_i32_0 = arith.constant 0 : i32
    return %arg0, %c0_i32 : i32, i32
  }
}

</mosaic_0001>

<bundles_post_ra>
// kernel: tpu_custom_call.1
= control target key start
LH: loop header
LB: loop body
LE: loop exit
PB: predicated region body
PF: predicated region fallthrough
CT: control target
= control target key end

     0   :  { %vm120_vm0 = vcmask 31744   ;;  %s298_s2 = inlined_call_operand.vmem [shape: f32[128,4], index: 2, kind: input, shape index: {}]   ;;  %s299_s0 = inlined_call_operand.vmem [shape: f32[16,128], index: 0, kind: input, shape index: {}]   ;;  %s300_s1 = inlined_call_operand.vmem [shape: f32[1,128], index: 1, kind: input, shape index: {}]   ;;  %s301_s3 = inlined_call_operand.vmem [shape: f32[16,4], index: 3, kind: output, shape index: {}]  }
   0x1   :  { %v27_v0 = vld [vmem:[%s298_s2] sm:$0xff]  ;;  %v28_v1 = vld [vmem:[%s298_s2 + $0x8] sm:$0xff]  ;;  %v29_v2 = vld [vmem:[%s298_s2 + $0x10] sm:$0xff] }
   0x2   :  { %v183_v3 = vpack.c.bf16 %v28_v1, %v27_v0  ;;  %v30_v4 = vld [vmem:[%s298_s2 + $0x18] sm:$0xff]  ;;  %v31_v6 = vld [vmem:[%s298_s2 + $0x20] sm:$0xff]  ;;  %v32_v7 = vld [vmem:[%s298_s2 + $0x28] sm:$0xff] }
   0x3   :  { %v187_v5 = vpack.c.bf16 %v30_v4, %v29_v2  ;;  %v191_v8 = vpack.c.bf16 %v32_v7, %v31_v6  ;;  %v14_v9 = vld [vmem:[%s299_s0] sm:$0xff]  ;;  %v33_v10 = vld [vmem:[%s298_s2 + $0x30] sm:$0xff]  ;;  %v34_v11 = vld [vmem:[%s298_s2 + $0x38] sm:$0xff] }
   0x4   :  { %184 = vmatprep.subr.bf16.mxu0 %v183_v3  ;;  %v127_v12 = vld [vmem:[%s300_s1] ss:$0 sm:$0xff]  ;;  %v195_v14 = vpack.c.bf16 %v34_v11, %v33_v10  ;;  %v36_v17 = vld [vmem:[%s298_s2 + $0x48] sm:$0xff]  ;;  %v37_v19 = vld [vmem:[%s298_s2 + $0x50] sm:$0xff] }
   0x5   :  { %186 = vmatpush3.bf16.msra.mxu0 %v183_v3  ;;  %v23_v13 = vsub.f32 %v14_v9, %v127_v12  ;;  %v35_v16 = vld [vmem:[%s298_s2 + $0x40] sm:$0xff]  ;;  %v38_v20 = vld [vmem:[%s298_s2 + $0x58] sm:$0xff]  ;;  %v40_v23 = vld [vmem:[%s298_s2 + $0x68] sm:$0xff] }
   0x6   :  { %188 = vmatprep.subr.bf16.mxu0 %v187_v5  ;;  %v199_v18 = vpack.c.bf16 %v36_v17, %v35_v16  ;;  %v203_v21 = vpack.c.bf16 %v38_v20, %v37_v19  ;;  %v39_v22 = vld [vmem:[%s298_s2 + $0x60] sm:$0xff]  ;;  %v41_v25 = vld [vmem:[%s298_s2 + $0x70] sm:$0xff]  ;;  %v42_v26 = vld [vmem:[%s298_s2 + $0x78] sm:$0xff] }
   0x7   :  { %v25_v15 = vmul.f32 %v23_v13, %v23_v13  ;;  %v207_v24 = vpack.c.bf16 %v40_v23, %v39_v22  ;;  %v15_v27 = vld [vmem:[%s299_s0 + $0x8] sm:$0xff]  ;;  %v211_v28 = vpack.c.bf16 %v42_v26, %v41_v25 }
   0x8   :  { %v24_v29 = vsub.f32 %v15_v27, %v127_v12 }
   0x9   :  { %190 = vmatpush3.bf16.msra.mxu0 %v187_v5  ;;  %180 = vmatprep.mubr.f32.mxu0 %v25_v15 }
   0xa   :  { %192 = vmatprep.subr.bf16.mxu0 %v191_v8  ;;  %v26_v30 = vmul.f32 %v24_v29, %v24_v29 }
   0xd   :  { %194 = vmatpush3.bf16.msra.mxu0 %v191_v8 }
   0xe   :  { %196 = vmatprep.subr.bf16.mxu0 %v195_v14 }
  0x11   :  { %198 = vmatpush3.bf16.msra.mxu0 %v195_v14 }
  0x12   :  { %200 = vmatprep.subr.bf16.mxu0 %v199_v18 }
  0x15   :  { %202 = vmatpush3.bf16.msra.mxu0 %v199_v18 }
  0x16   :  { %204 = vmatprep.subr.bf16.mxu0 %v203_v21 }
  0x19   :  { %206 = vmatpush3.bf16.msra.mxu0 %v203_v21 }
  0x1a   :  { %208 = vmatprep.subr.bf16.mxu0 %v207_v24 }
  0x1d   :  { %210 = vmatpush3.bf16.msra.mxu0 %v207_v24 }
  0x1e   :  { %212 = vmatprep.subr.bf16.mxu0 %v211_v28 }
  0x21   :  { %214 = vmatpush3.bf16.msra.mxu0 %v211_v28 }
  0x24   :  { %181 = vmatmul.mubr.f32.vlgmr.msra.gmra.mrb[0].mxu0 %v26_v30 }
  0xf7   :  { %v182_v31 = vpop.f32.mrb[0].mxu0 }
  0xf8   :  { %v129_v32 = vadd.f32 -29.406033, %v182_v31  ;;  %v109_v33 = vpop.f32.mrb[1].mxu0 }
  0xf9   :  { %v128_v34 = vadd.f32 -29.406033, %v109_v33 }
  0xfa   :  { %122 = vst.msk [vmem:[%s301_s3 + $0x8] sm:$0xff] %vm120_vm0, %v129_v32 }
  0xfb   :  { %121 = vst.msk [vmem:[%s301_s3] sm:$0xff] %vm120_vm0, %v128_v34 }

</bundles_post_ra>
